<compile_context>
chip_gen: v7x
topology: tpu7x:2x2x1
jax: 0.10.0
libtpu: 0.0.40
codegen_flags: <defaults>
</compile_context>

<pallas_src>
import jax
import jax.numpy as jnp
from jax.experimental import pallas as pl
from jax.experimental.pallas import tpu as pltpu

# Small, fixed problem size (consistent with the module's conv shapes).
N, C, H, W = 2, 4, 16, 16
K = 3                      # 3x3 conv, padding=1 -> same spatial size
NC = N * C                 # 8  rows  (batch x channels)
HW = H * W                 # 256 lanes (flattened spatial, multiple of 128)
PAD = 128                  # flat zero-pad on each side (aligned interior store)
HWP = HW + 2 * PAD         # padded flat spatial length
WCOLS = (K * K + 1) * NC   # 80 = 9 tap blocks + 1 bias block


def dag_block_kernel(x_ref, w_ref, o_ref, xpad_ref):
    # x_ref   : (NC, HW)     lane-dense input, rows ordered (n, c_in)
    # w_ref   : (NC, WCOLS)  fused conv weights (tap-major, block-diag over n,
    #                        bias folded into the last NCxNC block)
    # o_ref   : (NC, HW)     lane-dense output, rows ordered (n, c_out)
    # xpad_ref: (NC, HWP)    VMEM scratch: flat spatial axis zero-padded
    x = x_ref[...]                                      # (NC, HW) f32

    # Zero-pad the flattened spatial axis inside the kernel (no jnp.pad glue).
    xpad_ref[...] = jnp.zeros_like(xpad_ref)
    xpad_ref[:, PAD:PAD + HW] = x                       # aligned interior store

    # Column-validity masks for the horizontal taps (row taps are handled by
    # the zero pad; flat shifts of +-W land in the pad region at image edges).
    lane = jax.lax.broadcasted_iota(jnp.int32, (NC, HW), 1)
    col = lane % W
    left_ok = col > 0            # valid output columns when reading w-1
    right_ok = col < (W - 1)     # valid output columns when reading w+1

    # Build the (K*K*NC + NC, HW) patch matrix: 9 shifted/masked copies of x
    # plus a ones block that multiplies the bias columns of w_ref.
    taps = []
    for oy in (-1, 0, 1):
        for ox in (-1, 0, 1):
            off = oy * W + ox
            p = xpad_ref[:, PAD + off:PAD + off + HW]   # (NC, HW)
            if ox == -1:
                p = jnp.where(left_ok, p, 0.0)
            elif ox == 1:
                p = jnp.where(right_ok, p, 0.0)
            taps.append(p)
    taps.append(jnp.ones((NC, HW), jnp.float32))        # bias block
    pmat = jnp.concatenate(taps, axis=0)                # (WCOLS, HW) = (80, 256)

    # Single MXU dot: conv3x3 + bias for both batch elements at once.
    conv = jnp.dot(w_ref[...], pmat,
                   preferred_element_type=jnp.float32)  # (NC, HW)

    # main-branch ReLU, then identity-shortcut residual add (post_act = None).
    o_ref[...] = jnp.maximum(conv, 0.0) + x             # full-width vst


def dag_block(x_nchw, weight, bias):
    """x_nchw: (N, C, H, W) f32.  weight: (K, K, C_in, C_out).  bias: (C,)."""
    n, c, h, w = x_nchw.shape
    x2 = x_nchw.reshape(n * c, h * w)                   # free, contiguous

    # Fuse the 9 conv taps + bias into one (NC, WCOLS) matrix (built once,
    # wrapper side).  Column order: tap-major, within a tap (n, c_in); last
    # block carries the bias on its diagonal (multiplied by the ones block).
    eye = jnp.eye(n, dtype=jnp.float32)
    blocks = [jnp.kron(eye, weight[dy, dx].T.astype(jnp.float32))
              for dy in range(K) for dx in range(K)]
    blocks.append(jnp.diag(jnp.tile(bias.astype(jnp.float32), n)))
    wbig = jnp.concatenate(blocks, axis=1)              # (NC, WCOLS) = (8, 80)

    out2 = pl.pallas_call(
        dag_block_kernel,
        out_shape=jax.ShapeDtypeStruct((n * c, h * w), jnp.float32),
        grid=(1,),                                      # single step: both images
        in_specs=[
            pl.BlockSpec((NC, HW), lambda i: (0, 0)),
            pl.BlockSpec((NC, WCOLS), lambda i: (0, 0)),
        ],
        out_specs=pl.BlockSpec((NC, HW), lambda i: (0, 0)),
        scratch_shapes=[pltpu.VMEM((NC, HWP), jnp.float32)],
        compiler_params=pltpu.CompilerParams(
            dimension_semantics=("arbitrary",)),
    )(x2, wbig)

    return out2.reshape(n, c, h, w)                     # free reshape back


def _reference(x_nchw, weight, bias):
    # Pure-JAX reference of the same DAGBlock instantiation.
    x = jnp.transpose(x_nchw, (0, 2, 3, 1))
    y = jax.lax.conv_general_dilated(
        x, weight, window_strides=(1, 1), padding="SAME",
        dimension_numbers=("NHWC", "HWIO", "NHWC"))
    y = jnp.maximum(y + bias.reshape(1, 1, 1, C), 0.0) + x
    return jnp.transpose(y, (0, 3, 1, 2))


if __name__ == "__main__":
    key = jax.random.PRNGKey(0)
    kx, kw, kb = jax.random.split(key, 3)
    x = jax.random.normal(kx, (N, C, H, W), jnp.float32)
    weight = jax.random.normal(kw, (K, K, C, C), jnp.float32) * 0.1
    bias = jax.random.normal(kb, (C,), jnp.float32) * 0.1

    out = dag_block(x, weight, bias)
    out = jax.block_until_ready(out)

    ref = _reference(x, weight, bias)
    assert out.shape == (N, C, H, W)
    assert jnp.allclose(out, ref, atol=1e-4, rtol=1e-4), "mismatch vs reference"

    print("KERNEL_OK")
</pallas_src>

<mosaic_0001>
module attributes {stable_mosaic.version = 11 : i64} {
  func.func @dag_block_kernel(%arg0: i32, %arg1: memref<8x256xf32, #tpu.memory_space<vmem>>, %arg2: memref<8x80xf32, #tpu.memory_space<vmem>>, %arg3: memref<8x256xf32, #tpu.memory_space<vmem>>, %arg4: memref<8x512xf32, #tpu.memory_space<vmem>>) attributes {dimension_semantics = [#tpu.dimension_semantics<arbitrary>], iteration_bounds = array<i64: 1>, scalar_prefetch = 0 : i64, scratch_operands = 1 : i64, tpu.core_type = #tpu.core_type<tc>, window_params = [{pipeline_mode = #tpu.pipeline_mode<synchronous>, transform_indices = @transform_0, window_bounds = array<i64: 8, 256>}, {pipeline_mode = #tpu.pipeline_mode<synchronous>, transform_indices = @transform_1, window_bounds = array<i64: 8, 80>}, {pipeline_mode = #tpu.pipeline_mode<synchronous>, transform_indices = @transform_2, window_bounds = array<i64: 8, 256>}]} {
    %c0 = arith.constant 0 : index
    %c0_0 = arith.constant 0 : index
    %0 = vector.load %arg1[%c0, %c0_0] : memref<8x256xf32, #tpu.memory_space<vmem>>, vector<8x256xf32>
    %cst = arith.constant 0.000000e+00 : f32
    %1 = vector.broadcast %cst : f32 to vector<8x512xf32>
    %c0_1 = arith.constant 0 : index
    %c0_2 = arith.constant 0 : index
    %2 = vector.load %arg4[%c0_1, %c0_2] : memref<8x512xf32, #tpu.memory_space<vmem>>, vector<8x512xf32>
    tpu.vector_store %arg4[%c0_1, %c0_2], %1 {strides = array<i32>} : memref<8x512xf32, #tpu.memory_space<vmem>>, vector<8x512xf32>,
    %c0_3 = arith.constant 0 : index
    %c128 = arith.constant 128 : index
    %3 = vector.load %arg4[%c0_3, %c128] : memref<8x512xf32, #tpu.memory_space<vmem>>, vector<8x256xf32>
    tpu.vector_store %arg4[%c0_3, %c128], %0 {strides = array<i32>} : memref<8x512xf32, #tpu.memory_space<vmem>>, vector<8x256xf32>,
    %4 = tpu.iota {dimensions = array<i32: 1>} : vector<8x256xi32>
    %c16_i32 = arith.constant 16 : i32
    %c0_i32 = arith.constant 0 : i32
    %5 = arith.cmpi eq, %c16_i32, %c0_i32 : i32
    %c1_i32 = arith.constant 1 : i32
    %6 = arith.select %5, %c1_i32, %c16_i32 : i32
    %7 = vector.broadcast %6 : i32 to vector<8x256xi32>
    %8 = arith.remsi %4, %7 : vector<8x256xi32>
    %c0_i32_4 = arith.constant 0 : i32
    %9 = vector.broadcast %c0_i32_4 : i32 to vector<8x256xi32>
    %10 = arith.cmpi ne, %8, %9 : vector<8x256xi32>
    %c0_i32_5 = arith.constant 0 : i32
    %11 = vector.broadcast %c0_i32_5 : i32 to vector<8x256xi32>
    %12 = arith.cmpi slt, %8, %11 : vector<8x256xi32>
    %c0_i32_6 = arith.constant 0 : i32
    %13 = arith.cmpi slt, %6, %c0_i32_6 : i32
    %14 = vector.broadcast %13 : i1 to vector<8x256xi1>
    %15 = vector.broadcast %14 : vector<8x256xi1> to vector<8x256xi1>
    %16 = arith.xori %12, %15 : vector<8x256xi1>
    %17 = arith.andi %16, %10 : vector<8x256xi1>
    %18 = vector.broadcast %6 : i32 to vector<8x256xi32>
    %19 = arith.addi %8, %18 : vector<8x256xi32>
    %20 = arith.select %17, %19, %8 : vector<8x256xi1>, vector<8x256xi32>
    %c0_i32_7 = arith.constant 0 : i32
    %21 = vector.broadcast %c0_i32_7 : i32 to vector<8x256xi32>
    %22 = arith.cmpi sgt, %20, %21 : vector<8x256xi32>
    %c15_i32 = arith.constant 15 : i32
    %23 = vector.broadcast %c15_i32 : i32 to vector<8x256xi32>
    %24 = arith.cmpi slt, %20, %23 : vector<8x256xi32>
    %c0_8 = arith.constant 0 : index
    %c111 = arith.constant 111 : index
    %25 = vector.load %arg4[%c0_8, %c111] : memref<8x512xf32, #tpu.memory_space<vmem>>, vector<8x256xf32>
    %cst_9 = arith.constant 0.000000e+00 : f32
    %26 = vector.broadcast %cst_9 : f32 to vector<8x256xf32>
    %27 = arith.select %22, %25, %26 : vector<8x256xi1>, vector<8x256xf32>
    %c0_10 = arith.constant 0 : index
    %c112 = arith.constant 112 : index
    %28 = vector.load %arg4[%c0_10, %c112] : memref<8x512xf32, #tpu.memory_space<vmem>>, vector<8x256xf32>
    %c0_11 = arith.constant 0 : index
    %c113 = arith.constant 113 : index
    %29 = vector.load %arg4[%c0_11, %c113] : memref<8x512xf32, #tpu.memory_space<vmem>>, vector<8x256xf32>
    %cst_12 = arith.constant 0.000000e+00 : f32
    %30 = vector.broadcast %cst_12 : f32 to vector<8x256xf32>
    %31 = arith.select %24, %29, %30 : vector<8x256xi1>, vector<8x256xf32>
    %c0_13 = arith.constant 0 : index
    %c127 = arith.constant 127 : index
    %32 = vector.load %arg4[%c0_13, %c127] : memref<8x512xf32, #tpu.memory_space<vmem>>, vector<8x256xf32>
    %cst_14 = arith.constant 0.000000e+00 : f32
    %33 = vector.broadcast %cst_14 : f32 to vector<8x256xf32>
    %34 = arith.select %22, %32, %33 : vector<8x256xi1>, vector<8x256xf32>
    %c0_15 = arith.constant 0 : index
    %c128_16 = arith.constant 128 : index
    %35 = vector.load %arg4[%c0_15, %c128_16] : memref<8x512xf32, #tpu.memory_space<vmem>>, vector<8x256xf32>
    %c0_17 = arith.constant 0 : index
    %c129 = arith.constant 129 : index
    %36 = vector.load %arg4[%c0_17, %c129] : memref<8x512xf32, #tpu.memory_space<vmem>>, vector<8x256xf32>
    %cst_18 = arith.constant 0.000000e+00 : f32
    %37 = vector.broadcast %cst_18 : f32 to vector<8x256xf32>
    %38 = arith.select %24, %36, %37 : vector<8x256xi1>, vector<8x256xf32>
    %c0_19 = arith.constant 0 : index
    %c143 = arith.constant 143 : index
    %39 = vector.load %arg4[%c0_19, %c143] : memref<8x512xf32, #tpu.memory_space<vmem>>, vector<8x256xf32>
    %cst_20 = arith.constant 0.000000e+00 : f32
    %40 = vector.broadcast %cst_20 : f32 to vector<8x256xf32>
    %41 = arith.select %22, %39, %40 : vector<8x256xi1>, vector<8x256xf32>
    %c0_21 = arith.constant 0 : index
    %c144 = arith.constant 144 : index
    %42 = vector.load %arg4[%c0_21, %c144] : memref<8x512xf32, #tpu.memory_space<vmem>>, vector<8x256xf32>
    %c0_22 = arith.constant 0 : index
    %c145 = arith.constant 145 : index
    %43 = vector.load %arg4[%c0_22, %c145] : memref<8x512xf32, #tpu.memory_space<vmem>>, vector<8x256xf32>
    %cst_23 = arith.constant 0.000000e+00 : f32
    %44 = vector.broadcast %cst_23 : f32 to vector<8x256xf32>
    %45 = arith.select %24, %43, %44 : vector<8x256xi1>, vector<8x256xf32>
    %cst_24 = arith.constant 1.000000e+00 : f32
    %46 = vector.broadcast %cst_24 : f32 to vector<8x256xf32>
    %47 = tpu.concatenate %27, %28, %31, %34, %35, %38, %41, %42, %45, %46 in 0 : vector<8x256xf32>, vector<8x256xf32>, vector<8x256xf32>, vector<8x256xf32>, vector<8x256xf32>, vector<8x256xf32>, vector<8x256xf32>, vector<8x256xf32>, vector<8x256xf32>, vector<8x256xf32> -> vector<80x256xf32>
    %c0_25 = arith.constant 0 : index
    %c0_26 = arith.constant 0 : index
    %48 = vector.load %arg2[%c0_25, %c0_26] : memref<8x80xf32, #tpu.memory_space<vmem>>, vector<8x80xf32>
    %cst_27 = arith.constant dense<0.000000e+00> : vector<8x256xf32>
    %49 = tpu.matmul %48, %47, %cst_27 {dimension_numbers = #tpu.dot_dimension_numbers<[1], [0], [0], [1], [0, 0, 1, 1], [], []>} : vector<8x80xf32>, vector<80x256xf32>, vector<8x256xf32> -> vector<8x256xf32>
    %cst_28 = arith.constant 0.000000e+00 : f32
    %50 = vector.broadcast %cst_28 : f32 to vector<8x256xf32>
    %51 = arith.maximumf %49, %50 : vector<8x256xf32>
    %52 = arith.addf %51, %0 : vector<8x256xf32>
    %c0_29 = arith.constant 0 : index
    %c0_30 = arith.constant 0 : index
    %53 = vector.load %arg3[%c0_29, %c0_30] : memref<8x256xf32, #tpu.memory_space<vmem>>, vector<8x256xf32>
    tpu.vector_store %arg3[%c0_29, %c0_30], %52 {strides = array<i32>} : memref<8x256xf32, #tpu.memory_space<vmem>>, vector<8x256xf32>,
    return
  }
  func.func @transform_0(%arg0: i32) -> (i32, i32) {
    %c0_i32 = arith.constant 0 : i32
    %c0_i32_0 = arith.constant 0 : i32
    %c0_i32_1 = arith.constant 0 : i32
    return %c0_i32, %c0_i32_0 : i32, i32
  }
  func.func @transform_1(%arg0: i32) -> (i32, i32) {
    %c0_i32 = arith.constant 0 : i32
    %c0_i32_0 = arith.constant 0 : i32
    %c0_i32_1 = arith.constant 0 : i32
    return %c0_i32, %c0_i32_0 : i32, i32
  }
  func.func @transform_2(%arg0: i32) -> (i32, i32) {
    %c0_i32 = arith.constant 0 : i32
    %c0_i32_0 = arith.constant 0 : i32
    %c0_i32_1 = arith.constant 0 : i32
    return %c0_i32, %c0_i32_0 : i32, i32
  }
}

</mosaic_0001>

<bundles_post_ra>
// kernel: tpu_custom_call.1
= control target key start
LH: loop header
LB: loop body
LE: loop exit
PB: predicated region body
PF: predicated region fallthrough
CT: control target
= control target key end

     0   :  { %7 = vsyncpa [#allocation4], 0  ;;  %s596_s0 = inlined_call_operand.hbm [shape: f32[8,256], index: 0, kind: input, shape index: {}]   ;;  %s597_s1 = inlined_call_operand.hbm [shape: f32[8,80], index: 1, kind: input, shape index: {}]   ;;  %s598_s2 = inlined_call_operand.hbm [shape: f32[8,256], index: 2, kind: output, shape index: {}]  }
   0x1   :  { %8 = vsyncpa [#allocation7], 0 }
   0x2   :  { %9 = vsyncpa [#allocation5], 0  ;;  %s454_s9 = smov [#allocation3]   ;;  %s455_s11 = smov [#allocation6]  }
   0x3   :  { %s16_s10 = sshll.u32 %s454_s9, 4  ;;  %s26_s12 = sshll.u32 %s455_s11, 4  ;;  %s17_s10 = int_to_ptr.vmem [resolvable:$true] %s16_s10  ;;  %s27_s12 = int_to_ptr.vmem [resolvable:$true] %s26_s12 }
   0x4   :  { %s382_s15 = scalar_lea.hbm %s596_s0, 256 }
   0x5   :  { %p383_p0 = scmp.ne.s32.totalorder %s596_s0, %s382_s15  ;;  %p386_p1 = scmp.lt.u32.totalorder %s382_s15, %s596_s0 }
   0x7   :  { %p388_p2 = pnand %p386_p1, %p383_p0 }
   0x9   :  { %391 = shalt.err (!%p388_p2)
}
   0xa   :  { %s392_s20 = scalar_lea.vmem %s17_s10, 256  ;;  %p397_p4 = scmp.lt.s32.totalorder %s17_s10, %s17_s10 }
   0xb   :  { %p393_p3 = scmp.ne.s32.totalorder %s17_s10, %s392_s20  ;;  %p398_p5 = scmp.lt.s32.totalorder %s392_s20, %s392_s20 }
   0xd   :  { %p399_p6 = por %p398_p5, %p397_p4 }
   0xf   :  { %p400_p7 = pnand %p399_p6, %p393_p3 }
  0x11   :  { %403 = shalt.err (!%p400_p7)
}
  0x12   :  { %19 = dma.hbm_to_vmem [thread:$0]  %s596_s0, 256, %s17_s10, [#allocation4]  }
  0x13   :  { %s404_s25 = scalar_lea.hbm %s597_s1, 128 }
  0x14   :  { %p405_p8 = scmp.ne.s32.totalorder %s597_s1, %s404_s25  ;;  %p408_p9 = scmp.lt.u32.totalorder %s404_s25, %s597_s1 }
  0x16   :  { %p410_p10 = pnand %p408_p9, %p405_p8 }
  0x18   :  { %413 = shalt.err (!%p410_p10)
}
  0x19   :  { %s414_s30 = scalar_lea.vmem %s27_s12, 128  ;;  %p419_p12 = scmp.lt.s32.totalorder %s27_s12, %s27_s12 }
  0x1a   :  { %p415_p11 = scmp.ne.s32.totalorder %s27_s12, %s414_s30  ;;  %p420_p13 = scmp.lt.s32.totalorder %s414_s30, %s414_s30 }
  0x1c   :  { %p421_p0 = por %p420_p13, %p419_p12 }
  0x1e   :  { %p422_p1 = pnand %p421_p0, %p415_p11 }
  0x20   :  { %425 = shalt.err (!%p422_p1)
}
  0x21   :  { %29 = dma.hbm_to_vmem [thread:$0]  %s597_s1, 128, %s27_s12, [#allocation7]  }
  0x22   :  { %448 = dma.done.wait [#allocation4], 256  }
  0x23   :  { %449 = vsyncadd [#allocation4], 4294967040 }
  0x24   :  { %450 = dma.done.wait [#allocation7], 128  }
  0x25   :  { %451 = vsyncadd [#allocation7], 4294967168  ;;  %v456_v0 = vmov 0.0   ;;  %s457_s4 = smov 17   ;;  %s458_s5 = smov 16   ;;  %v507_v1 = vld [vmem:[#allocation3] sm:$0xff]  ;;  %v44_v5 = vlaneseq }
  0x26   :  { %81 = vrot.lane.b32.xlu1 %v456_v0, %s457_s4  ;;  %256 = vmatprep.mubr.f32.mxu0 %v456_v0  ;;  %v509_v2 = vld [vmem:[#allocation3 + $0x8] sm:$0xff]  ;;  %s459_s6 = smov 1   ;;  %s460_s1 = smov 15   ;;  %vm87_vm0 = vcmask 138240   ;;  %vm171_vm2 = vcmask 130048   ;;  %vm113_vm4 = vcmask 7168  }
  0x27   :  { %v342_v3 = vpack.i.bf16 %v509_v2, %v507_v1  ;;  %s461_s7 = smov 127   ;;  %v372_v4 = vpack.i.bf16 %v456_v0, %v509_v2  ;;  %s462_s8 = smov 112   ;;  %v45_v7 = vand.u32 127, %v44_v5  ;;  %vm465_vm5 = vmmov 1  }
  0x28   :  { %s463_s9 = smov 113   ;;  %s464_s10 = smov 111   ;;  %vm100_vm9 = vcmask 121856   ;;  %vm132_vm13 = vcmask 1039360   ;;  %vm182_vm14 = vcmask 916480  }
  0x29   :  { %343 = vrot.lane.b32.xlu0 %v342_v3, %s457_s4  ;;  %v46_v9 = vadd.s32 128, %v45_v7  ;;  %v51_v13 = vand.u32 15, %v45_v7  ;;  %s467_s11 = smov [#allocation8]  }
  0x2a   :  { %165 = vrot.lane.b32.xlu1 %v456_v0, %s458_s5  ;;  %s275_s12 = sshll.u32 %s467_s11, 4  ;;  %s276_s12 = int_to_ptr.vmem [resolvable:$true] %s275_s12 }
  0x2b   :  { %v58_v12 = vand.u32 15, %v46_v9  ;;  %vm522_vm3 = vcmp.gt.s32.totalorder %v51_v13, 0  ;;  %vm549_vm10 = vcmp.lt.s32.totalorder %v51_v13, 15  ;;  %v187_v13 = vld [vmem:[#allocation6] sm:$0xff]  ;;  %s426_s13 = scalar_lea.vmem %s276_s12, 256  ;;  %p431_p3 = scmp.lt.s32.totalorder %s276_s12, %s276_s12 }
  0x2c   :  { %vm542_vm8 = vmpackc.low %vm465_vm5, %vm522_vm3  ;;  %p427_p2 = scmp.ne.s32.totalorder %s276_s12, %s426_s13  ;;  %p432_p4 = scmp.lt.s32.totalorder %s426_s13, %s426_s13 }
  0x2d   :  { %348 = vrot.lane.b32.xlu0 %v342_v3, %s458_s5  ;;  %vm518_vm1 = vcmp.gt.s32.totalorder %v58_v12, 0  ;;  %vm535_vm7 = vcmp.lt.s32.totalorder %v58_v12, 15  ;;  %vm308_vm12 = vmpackc.low %vm522_vm3, %vm549_vm10 }
  0x2e   :  { %358 = vrot.lane.b32.xlu1 %v342_v3, %s459_s6  ;;  %vm530_vm6 = vmpackc.low %vm465_vm5, %vm518_vm1  ;;  %p433_p5 = por %p432_p4, %p431_p3 }
  0x2f   :  { %vm305_vm11 = vmpackc.low %vm518_vm1, %vm535_vm7  ;;  %vm145_vm1 = vcmask 924672  }
  0x30   :  { %vm311_vm15 = vmpackc.low %vm535_vm7, %vm465_vm5  ;;  %p434_p6 = pnand %p433_p5, %p427_p2 }
  0x31   :  { %353 = vrot.lane.b32.xlu0 %v342_v3, %s460_s1  ;;  %vm323_vm3 = vmpackc.low %vm465_vm5, %vm535_vm7 }
  0x32   :  { %107 = vrot.lane.b32.xlu1 %v456_v0, %s459_s6 }
  0x35   :  { %94 = vrot.lane.b32.xlu0 %v456_v0, %s460_s1 }
  0x36   :  { %126 = vrot.lane.b32.xlu1 %v507_v1, %s461_s7 }
  0x39   :  { %363 = vrot.lane.b32.xlu0 %v372_v4, %s461_s7 }
  0x3a   :  { %373 = vrot.lane.b32.xlu1 %v372_v4, %s462_s8 }
  0x3d   :  { %368 = vrot.lane.b32.xlu0 %v372_v4, %s463_s9 }
  0x3e   :  { %176 = vrot.lane.b32.xlu1 %v507_v1, %s462_s8 }
  0x41   :  { %139 = vrot.lane.b32.xlu0 %v507_v1, %s463_s9 }
  0x42   :  { %152 = vrot.lane.b32.xlu1 %v507_v1, %s464_s10 }
  0x45   :  { %378 = vrot.lane.b32.xlu0 %v372_v4, %s464_s10 }
  0x98   :  { %v82_v6 = vpop.permute.xlu1 %81 }
  0x9b   :  { %v344_v10 = vpop.permute.xlu0 %343 }
  0x9c   :  { %v166_v8 = vpop.permute.xlu1 %165  ;;  %v346_v14 = vunpack.i.h.bf16 %v344_v10  ;;  %v345_v15 = vunpack.i.l.bf16 %v344_v10  ;;  %v466_v10 = vmov 1.0  }
  0x9e   :  { %v89_v24 = vsel %vm87_vm0, %v345_v15, %v346_v14  ;;  %v88_v27 = vsel %vm87_vm0, %v82_v6, %v345_v15  ;;  %vm314_vm0 = vmpackc.low %vm549_vm10, %vm465_vm5 }
  0x9f   :  { %v349_v16 = vpop.permute.xlu0 %348 }
  0xa0   :  { %v359_v11 = vpop.permute.xlu1 %358  ;;  %v351_v20 = vunpack.i.h.bf16 %v349_v16  ;;  %v350_v21 = vunpack.i.l.bf16 %v349_v16 }
  0xa1   :  { %v361_v22 = vunpack.i.h.bf16 %v359_v11  ;;  %v360_v23 = vunpack.i.l.bf16 %v359_v11 }
  0xa2   :  { %v173_v25 = vsel %vm171_vm2, %v350_v21, %v351_v20  ;;  %v172_v28 = vsel %vm171_vm2, %v166_v8, %v350_v21  ;;  %vm158_vm2 = vcmask 908288  }
  0xa3   :  { %v354_v29 = vpop.permute.xlu0 %353  ;;  %v298_v31 = vpack.c.bf16 %v173_v25, %v89_v24  ;;  %v301_v32 = vpack.c.bf16 %v172_v28, %v88_v27  ;;  %v115_v37 = vsel %vm113_vm4, %v360_v23, %v361_v22 }
  0xa4   :  { %v108_v19 = vpop.permute.xlu1 %107  ;;  %v356_v35 = vunpack.i.h.bf16 %v354_v29  ;;  %v355_v36 = vunpack.i.l.bf16 %v354_v29 }
  0xa5   :  { %300 = vmatprep.subr.msk.bf16.mxu0 %vm530_vm6, %v298_v31  ;;  %v114_v39 = vsel %vm113_vm4, %v108_v19, %v360_v23  ;;  %vm326_vm4 = vmpackc.low %vm465_vm5, %vm549_vm10 }
  0xa6   :  { %303 = vmatpush1.bf16.msk.msra.mxu0 %vm542_vm8, %v301_v32  ;;  %v102_v40 = vsel %vm100_vm9, %v355_v36, %v356_v35 }
  0xa7   :  { %v95_v41 = vpop.permute.xlu0 %94  ;;  %v304_v42 = vpack.c.bf16 %v115_v37, %v102_v40 }
  0xa8   :  { %v127_v34 = vpop.permute.xlu1 %126  ;;  %v101_v43 = vsel %vm100_vm9, %v95_v41, %v355_v36 }
  0xa9   :  { %v307_v44 = vpack.c.bf16 %v114_v39, %v101_v43  ;;  %306 = vmatprep.subr.msk.bf16.mxu0 %vm305_vm11, %v304_v42 }
  0xab   :  { %v364_v46 = vpop.permute.xlu0 %363  ;;  %309 = vmatpush1.bf16.msk.msra.mxu0 %vm308_vm12, %v307_v44 }
  0xac   :  { %v374_v45 = vpop.permute.xlu1 %373  ;;  %v366_v47 = vunpack.i.h.bf16 %v364_v46  ;;  %v365_v48 = vunpack.i.l.bf16 %v364_v46 }
  0xad   :  { %v376_v49 = vunpack.i.h.bf16 %v374_v45  ;;  %v375_v50 = vunpack.i.l.bf16 %v374_v45 }
  0xae   :  { %v133_v51 = vsel %vm132_vm13, %v127_v34, %v365_v48  ;;  %v134_v52 = vsel %vm132_vm13, %v365_v48, %v366_v47 }
  0xaf   :  { %v310_v53 = vpack.c.bf16 %v134_v52, %v509_v2  ;;  %v313_v54 = vpack.c.bf16 %v133_v51, %v507_v1  ;;  %v369_v55 = vpop.permute.xlu0 %368  ;;  %v184_v59 = vsel %vm182_vm14, %v375_v50, %v376_v49 }
  0xb0   :  { %v177_v56 = vpop.permute.xlu1 %176  ;;  %v371_v57 = vunpack.i.h.bf16 %v369_v55  ;;  %v370_v58 = vunpack.i.l.bf16 %v369_v55 }
  0xb1   :  { %312 = vmatprep.subr.msk.bf16.mxu0 %vm311_vm15, %v310_v53  ;;  %v183_v60 = vsel %vm182_vm14, %v177_v56, %v375_v50 }
  0xb2   :  { %315 = vmatpush1.bf16.msk.msra.mxu0 %vm314_vm0, %v313_v54  ;;  %v147_v61 = vsel %vm145_vm1, %v370_v58, %v371_v57 }
  0xb3   :  { %v140_v62 = vpop.permute.xlu0 %139  ;;  %v316_v63 = vpack.c.bf16 %v184_v59, %v147_v61 }
  0xb4   :  { %v146_v0 = vsel %vm145_vm1, %v140_v62, %v370_v58  ;;  %v153_v5 = vpop.permute.xlu1 %152 }
  0xb5   :  { %v319_v3 = vpack.c.bf16 %v183_v60, %v146_v0  ;;  %318 = vmatprep.subr.msk.bf16.mxu0 %vm530_vm6, %v316_v63  ;;  %vm188_vm6 = vcmask 654336  }
  0xb7   :  { %v379_v4 = vpop.permute.xlu0 %378  ;;  %321 = vmatpush1.bf16.msk.msra.mxu0 %vm542_vm8, %v319_v3 }
  0xb8   :  { %v381_v6 = vunpack.i.h.bf16 %v379_v4  ;;  %v380_v7 = vunpack.i.l.bf16 %v379_v4 }
  0xba   :  { %v159_v8 = vsel %vm158_vm2, %v153_v5, %v380_v7  ;;  %v160_v9 = vsel %vm158_vm2, %v380_v7, %v381_v6 }
  0xbb   :  { %v322_v11 = vpack.c.bf16 %v466_v10, %v160_v9  ;;  %v325_v12 = vpack.c.bf16 %v466_v10, %v159_v8 }
  0xbd   :  { %324 = vmatprep.subr.msk.bf16.mxu0 %vm323_vm3, %v322_v11 }
  0xbe   :  { %327 = vmatpush1.bf16.msk.msra.mxu0 %vm326_vm4, %v325_v12 }
  0xc1   :  { %297 = vmatmul.mubr.msk.f32.vlgmr.msra.gmra.mrb[0].mxu0 %vm188_vm6, %v187_v13 }
 0x194   :  { %v258_v14 = vpop.f32.mrb[0].mxu0 }
 0x195   :  { %v263_v15 = vmax.f32 %v258_v14, 0.0  ;;  %v260_v16 = vpop.f32.mrb[1].mxu0 }
 0x196   :  { %v264_v17 = vmax.f32 %v260_v16, 0.0 }
 0x197   :  { %v265_v18 = vadd.f32 %v263_v15, %v507_v1 }
 0x198   :  { %v266_v19 = vadd.f32 %v264_v17, %v509_v2 }
 0x199   :  { %267 = vst [vmem:[#allocation8] sm:$0xff] %v265_v18 }
 0x19a   :  { %268 = vst [vmem:[#allocation8 + $0x8] sm:$0xff] %v266_v19 }
 0x19b   :  { %437 = shalt.err (!%p434_p6)
}
 0x19c   :  { %s438_s16 = scalar_lea.hbm %s598_s2, 256 }
 0x19d   :  { %p439_p7 = scmp.ne.s32.totalorder %s598_s2, %s438_s16  ;;  %p442_p8 = scmp.lt.u32.totalorder %s438_s16, %s598_s2 }
 0x19f   :  { %p444_p9 = pnand %p442_p8, %p439_p7 }
 0x1a1   :  { %447 = shalt.err (!%p444_p9)
}
 0x1a2   :  { %278 = dma.vmem_to_hbm [thread:$0]  %s276_s12, 256, %s598_s2, [#allocation5]  }
 0x1a3   :  { %452 = dma.done.wait [#allocation5], 256  }
 0x1a4   :  { %453 = vsyncadd [#allocation5], 4294967040 }
 0x1a5   :  { %282 = vsyncpa [#allocation4], 1 }
 0x1a6   :  { %283 = vsyncpa [#allocation7], 1 }
 0x1a7   :  { %284 = vsyncpa [#allocation5], 1 }

</bundles_post_ra>
